<compile_context>
chip_gen: v5e
topology: v5e:2x2
jax: 0.10.0
libtpu: 0.0.40
codegen_flags: <defaults>
</compile_context>

<pallas_src>
import jax
import jax.numpy as jnp
from jax.experimental import pallas as pl
from jax.experimental.pallas import tpu as pltpu


def _round_up(x, m):
    return ((x + m - 1) // m) * m


def _num_tensorcores():
    """Best-effort count of TensorCores per chip (v7x has 2, v5e/v6e have 1)."""
    try:
        kind = jax.devices()[0].device_kind.lower()
        if "v7" in kind:
            return 2
    except Exception:
        pass
    return 1


def _pick_tm(N, num_cores, cap=1024):
    """Batch tile: one grid step per TensorCore, sublane (8) aligned."""
    tm = _round_up(pl.cdiv(N, max(num_cores, 1)), 8)
    tm = min(tm, cap)
    if tm >= N:
        tm = N  # single full-extent block (legal: equals the full array dim)
    return max(tm, 1)


def fcann2_kernel(x_ref, w1_ref, b1_ref, w2_ref, b2_ref, out_ref):
    # Cast activations to the compute dtype *inside* the kernel (free on VPU;
    # no extra HBM traffic).  For the f32 path this is a no-op.
    x = x_ref[...].astype(w1_ref.dtype)
    # hidden = relu(x @ W1^T + b1)  -- MXU matmul with f32 accumulation.
    hid = jnp.dot(x, w1_ref[...], preferred_element_type=jnp.float32) + b1_ref[...]
    hid = jnp.maximum(hid, 0.0).astype(w2_ref.dtype)
    # out = hidden @ W2^T + b2
    out = jnp.dot(hid, w2_ref[...], preferred_element_type=jnp.float32) + b2_ref[...]
    out_ref[...] = out.astype(out_ref.dtype)


def prepare_fcann2_params(w1, b1, w2, b2, *, compute_dtype=jnp.float32, lane=128):
    """One-time (model-init) prep: transpose to [K, N] layout for the MXU.

    Only the hidden dim (never written back to HBM as an activation) is
    zero-padded to a multiple of 128; the HBM-visible contraction/output dims
    keep their true sizes.

    PyTorch nn.Linear conventions:
      w1: [h, in_features], b1: [h], w2: [out_features, h], b2: [out_features]
    """
    h, in_f = w1.shape
    out_f = w2.shape[0]
    h_p = _round_up(h, lane)

    w1t = jnp.zeros((in_f, h_p), compute_dtype).at[:, :h].set(
        jnp.transpose(w1).astype(compute_dtype))
    w2t = jnp.zeros((h_p, out_f), compute_dtype).at[:h, :].set(
        jnp.transpose(w2).astype(compute_dtype))
    # Biases stay f32: they are added post-accumulation in f32.
    # Zero-padding of b1's extra lanes keeps relu(0)=0 -> no effect on matmul 2.
    b1p = jnp.zeros((1, h_p), jnp.float32).at[0, :h].set(b1.astype(jnp.float32))
    b2p = b2.astype(jnp.float32).reshape(1, out_f)

    return dict(
        w1t=w1t, b1=b1p, w2t=w2t, b2=b2p,
        in_features=in_f, h=h, out_features=out_f,
        compute_dtype=compute_dtype,
    )


def fcann2_forward(x, params, *, tm=None):
    """x: [N, in_features] f32. Returns [N, out_features] f32."""
    N, in_f = x.shape
    assert in_f == params["in_features"]
    w1t, b1, w2t, b2 = params["w1t"], params["b1"], params["w2t"], params["b2"]
    _, h_p = w1t.shape
    out_f = params["out_features"]

    if tm is None:
        tm = _pick_tm(N, _num_tensorcores())
    grid = (pl.cdiv(N, tm),)

    return pl.pallas_call(
        fcann2_kernel,
        out_shape=jax.ShapeDtypeStruct((N, out_f), jnp.float32),
        grid_spec=pltpu.PrefetchScalarGridSpec(
            num_scalar_prefetch=0,
            grid=grid,
            in_specs=[
                pl.BlockSpec((tm, in_f), lambda i: (i, 0)),     # x tile (pipelined)
                pl.BlockSpec((in_f, h_p), lambda i: (0, 0)),    # W1^T (grid-invariant)
                pl.BlockSpec((1, h_p), lambda i: (0, 0)),       # b1
                pl.BlockSpec((h_p, out_f), lambda i: (0, 0)),   # W2^T (grid-invariant)
                pl.BlockSpec((1, out_f), lambda i: (0, 0)),     # b2
            ],
            out_specs=pl.BlockSpec((tm, out_f), lambda i: (i, 0)),
        ),
        compiler_params=pltpu.CompilerParams(
            dimension_semantics=("parallel",),
            vmem_limit_bytes=32 * 1024 * 1024,
        ),
    )(x, w1t, b1, w2t, b2)


if __name__ == "__main__":
    # Shapes implied by the module: x [N, in_features]; hidden h; logits out_features.
    N, in_features, h, out_features = 512, 16, 32, 4

    key = jax.random.PRNGKey(0)
    kx, kw1, kw2 = jax.random.split(key, 3)

    x = jax.random.normal(kx, (N, in_features), dtype=jnp.float32)
    # Deterministic params matching __init__: weights ~ randn, biases = 0.
    w1 = jax.random.normal(kw1, (h, in_features), dtype=jnp.float32)
    b1 = jnp.zeros((h,), dtype=jnp.float32)
    w2 = jax.random.normal(kw2, (out_features, h), dtype=jnp.float32)
    b2 = jnp.zeros((out_features,), dtype=jnp.float32)

    # Reference forward (plain JAX, module semantics).
    ref = jnp.maximum(x @ w1.T + b1, 0.0) @ w2.T + b2

    # f32 compute path: exact module semantics.
    params_f32 = prepare_fcann2_params(w1, b1, w2, b2, compute_dtype=jnp.float32)
    out_f32 = jax.block_until_ready(fcann2_forward(x, params_f32))
    assert out_f32.shape == (N, out_features)
    assert jnp.allclose(out_f32, ref, atol=1e-4, rtol=1e-4)

    # bf16 compute / f32 accumulate fast path (cast happens inside the kernel).
    params_bf16 = prepare_fcann2_params(w1, b1, w2, b2, compute_dtype=jnp.bfloat16)
    out_bf16 = jax.block_until_ready(fcann2_forward(x, params_bf16))
    assert out_bf16.shape == (N, out_features)
    assert jnp.allclose(out_bf16, ref, atol=0.5, rtol=5e-2)

    # Ragged batch (N not a multiple of 8 / tm): exercises partial-block masking.
    N_ragged = 500
    x_r = x[:N_ragged]
    ref_r = ref[:N_ragged]
    out_r = jax.block_until_ready(fcann2_forward(x_r, params_f32))
    assert out_r.shape == (N_ragged, out_features)
    assert jnp.allclose(out_r, ref_r, atol=1e-4, rtol=1e-4)

    print("KERNEL_OK")
</pallas_src>

<mosaic_0001>
module attributes {stable_mosaic.version = 11 : i64} {
  func.func @fcann2_kernel(%arg0: i32, %arg1: memref<512x16xf32, #tpu.memory_space<vmem>>, %arg2: memref<16x128xf32, #tpu.memory_space<vmem>>, %arg3: memref<1x128xf32, #tpu.memory_space<vmem>>, %arg4: memref<128x4xf32, #tpu.memory_space<vmem>>, %arg5: memref<1x4xf32, #tpu.memory_space<vmem>>, %arg6: memref<512x4xf32, #tpu.memory_space<vmem>>) attributes {dimension_semantics = [#tpu.dimension_semantics<parallel>], iteration_bounds = array<i64: 1>, scalar_prefetch = 0 : i64, scratch_operands = 0 : i64, tpu.core_type = #tpu.core_type<tc>, window_params = [{transform_indices = @transform_0, window_bounds = array<i64: 512, 16>}, {pipeline_mode = #tpu.pipeline_mode<synchronous>, transform_indices = @transform_1, window_bounds = array<i64: 16, 128>}, {pipeline_mode = #tpu.pipeline_mode<synchronous>, transform_indices = @transform_2, window_bounds = array<i64: 1, 128>}, {pipeline_mode = #tpu.pipeline_mode<synchronous>, transform_indices = @transform_3, window_bounds = array<i64: 128, 4>}, {pipeline_mode = #tpu.pipeline_mode<synchronous>, transform_indices = @transform_4, window_bounds = array<i64: 1, 4>}, {transform_indices = @transform_5, window_bounds = array<i64: 512, 4>}]} {
    %c0 = arith.constant 0 : index
    %c0_0 = arith.constant 0 : index
    %0 = vector.load %arg1[%c0, %c0_0] : memref<512x16xf32, #tpu.memory_space<vmem>>, vector<512x16xf32>
    %c0_1 = arith.constant 0 : index
    %c0_2 = arith.constant 0 : index
    %1 = vector.load %arg2[%c0_1, %c0_2] : memref<16x128xf32, #tpu.memory_space<vmem>>, vector<16x128xf32>
    %cst = arith.constant dense<0.000000e+00> : vector<512x128xf32>
    %2 = tpu.matmul %0, %1, %cst {dimension_numbers = #tpu.dot_dimension_numbers<[1], [0], [0], [1], [0, 0, 1, 1], [], []>} : vector<512x16xf32>, vector<16x128xf32>, vector<512x128xf32> -> vector<512x128xf32>
    %c0_3 = arith.constant 0 : index
    %c0_4 = arith.constant 0 : index
    %3 = vector.load %arg3[%c0_3, %c0_4] : memref<1x128xf32, #tpu.memory_space<vmem>>, vector<1x128xf32>
    %4 = vector.broadcast %3 : vector<1x128xf32> to vector<512x128xf32>
    %5 = arith.addf %2, %4 : vector<512x128xf32>
    %cst_5 = arith.constant 0.000000e+00 : f32
    %6 = vector.broadcast %cst_5 : f32 to vector<512x128xf32>
    %7 = arith.maximumf %5, %6 : vector<512x128xf32>
    %c0_6 = arith.constant 0 : index
    %c0_7 = arith.constant 0 : index
    %8 = vector.load %arg4[%c0_6, %c0_7] : memref<128x4xf32, #tpu.memory_space<vmem>>, vector<128x4xf32>
    %cst_8 = arith.constant dense<0.000000e+00> : vector<512x4xf32>
    %9 = tpu.matmul %7, %8, %cst_8 {dimension_numbers = #tpu.dot_dimension_numbers<[1], [0], [0], [1], [0, 0, 1, 1], [], []>} : vector<512x128xf32>, vector<128x4xf32>, vector<512x4xf32> -> vector<512x4xf32>
    %c0_9 = arith.constant 0 : index
    %c0_10 = arith.constant 0 : index
    %10 = vector.load %arg5[%c0_9, %c0_10] : memref<1x4xf32, #tpu.memory_space<vmem>>, vector<1x4xf32>
    %11 = vector.broadcast %10 : vector<1x4xf32> to vector<512x4xf32>
    %12 = arith.addf %9, %11 : vector<512x4xf32>
    %c0_11 = arith.constant 0 : index
    %c0_12 = arith.constant 0 : index
    %13 = vector.load %arg6[%c0_11, %c0_12] : memref<512x4xf32, #tpu.memory_space<vmem>>, vector<512x4xf32>
    tpu.vector_store %arg6[%c0_11, %c0_12], %12 {strides = array<i32>} : memref<512x4xf32, #tpu.memory_space<vmem>>, vector<512x4xf32>,
    return
  }
  func.func @transform_0(%arg0: i32) -> (i32, i32) {
    %c0_i32 = arith.constant 0 : i32
    %c0_i32_0 = arith.constant 0 : i32
    return %arg0, %c0_i32 : i32, i32
  }
  func.func @transform_1(%arg0: i32) -> (i32, i32) {
    %c0_i32 = arith.constant 0 : i32
    %c0_i32_0 = arith.constant 0 : i32
    %c0_i32_1 = arith.constant 0 : i32
    return %c0_i32, %c0_i32_0 : i32, i32
  }
  func.func @transform_2(%arg0: i32) -> (i32, i32) {
    %c0_i32 = arith.constant 0 : i32
    %c0_i32_0 = arith.constant 0 : i32
    %c0_i32_1 = arith.constant 0 : i32
    return %c0_i32, %c0_i32_0 : i32, i32
  }
  func.func @transform_3(%arg0: i32) -> (i32, i32) {
    %c0_i32 = arith.constant 0 : i32
    %c0_i32_0 = arith.constant 0 : i32
    %c0_i32_1 = arith.constant 0 : i32
    return %c0_i32, %c0_i32_0 : i32, i32
  }
  func.func @transform_4(%arg0: i32) -> (i32, i32) {
    %c0_i32 = arith.constant 0 : i32
    %c0_i32_0 = arith.constant 0 : i32
    %c0_i32_1 = arith.constant 0 : i32
    return %c0_i32, %c0_i32_0 : i32, i32
  }
  func.func @transform_5(%arg0: i32) -> (i32, i32) {
    %c0_i32 = arith.constant 0 : i32
    %c0_i32_0 = arith.constant 0 : i32
    return %arg0, %c0_i32 : i32, i32
  }
}

</mosaic_0001>

<bundles_post_ra>
// kernel: tpu_custom_call.1
= control target key start
LH: loop header
LB: loop body
LE: loop exit
PB: predicated region body
PF: predicated region fallthrough
CT: control target
= control target key end

     0   :  { %vm90_vm0 = vcmask 130048   ;;  %vm785_vm1 = vcmask 31744   ;;  %s1688_s1 = inlined_call_operand.vmem [shape: f32[16,128], index: 1, kind: input, shape index: {}]   ;;  %s1689_s0 = inlined_call_operand.vmem [shape: f32[512,16], index: 0, kind: input, shape index: {}]   ;;  %s1690_s2 = inlined_call_operand.vmem [shape: f32[1,128], index: 2, kind: input, shape index: {}]   ;;  %s1691_s3 = inlined_call_operand.vmem [shape: f32[128,4], index: 3, kind: input, shape index: {}]   ;;  %s1692_s4 = inlined_call_operand.vmem [shape: f32[1,4], index: 4, kind: input, shape index: {}]   ;;  %s1693_s5 = inlined_call_operand.vmem [shape: f32[512,4], index: 5, kind: output, shape index: {}]  }
   0x1   :  { %v85_v0 = vld [vmem:[%s1688_s1 + $0x8] sm:$0xff]  ;;  %v84_v1 = vld [vmem:[%s1688_s1] sm:$0xff]  ;;  %v22_v4 = vld [vmem:[%s1689_s0 + $0x10] sm:$0xff] }
   0x2   :  { %297 = vmatpush.msra.mxu0 %v85_v0  ;;  %v20_v2 = vld [vmem:[%s1689_s0] sm:$0xff]  ;;  %918 = vmatpush.msra.mxu3 %v85_v0  ;;  %v21_v3 = vld [vmem:[%s1689_s0 + $0x8] sm:$0xff]  ;;  %v23_v5 = vld [vmem:[%s1689_s0 + $0x18] sm:$0xff] }
   0x3   :  { %v24_v6 = vld [vmem:[%s1689_s0 + $0x20] sm:$0xff]  ;;  %v25_v7 = vld [vmem:[%s1689_s0 + $0x28] sm:$0xff]  ;;  %v26_v8 = vld [vmem:[%s1689_s0 + $0x30] sm:$0xff] }
   0x4   :  { %298 = vmatpush.msra.mxu0 %v84_v1  ;;  %919 = vmatpush.msra.mxu3 %v84_v1  ;;  %v27_v9 = vld [vmem:[%s1689_s0 + $0x38] sm:$0xff]  ;;  %v28_v10 = vld [vmem:[%s1689_s0 + $0x40] sm:$0xff]  ;;  %v570_v12 = vld [vmem:[%s1691_s3 + $0x70] sm:$0xff] }
   0x5   :  { %854 = vmatmul.msk.f32.vlgmr.msra.gmra.mxu0 %vm90_vm0, %v20_v2  ;;  %v571_v11 = vld [vmem:[%s1691_s3 + $0x78] sm:$0xff]  ;;  %v569_v13 = vld [vmem:[%s1691_s3 + $0x68] sm:$0xff]  ;;  %v568_v15 = vld [vmem:[%s1691_s3 + $0x60] sm:$0xff] }
   0x6   :  { %576 = vmatpush.msra.mxu1 %v571_v11  ;;  %920 = vmatpush.msra.mxu2 %v571_v11  ;;  %v29_v14 = vld [vmem:[%s1689_s0 + $0x48] sm:$0xff]  ;;  %v567_v16 = vld [vmem:[%s1691_s3 + $0x58] sm:$0xff]  ;;  %v566_v17 = vld [vmem:[%s1691_s3 + $0x50] sm:$0xff] }
   0x7   :  { %921 = vmatpush.msrb.mxu3 %v571_v11  ;;  %v565_v18 = vld [vmem:[%s1691_s3 + $0x48] sm:$0xff]  ;;  %v30_v19 = vld [vmem:[%s1689_s0 + $0x50] sm:$0xff]  ;;  %v564_v20 = vld [vmem:[%s1691_s3 + $0x40] sm:$0xff] }
   0x8   :  { %577 = vmatpush.msra.mxu1 %v570_v12  ;;  %922 = vmatpush.msra.mxu2 %v570_v12  ;;  %v563_v21 = vld [vmem:[%s1691_s3 + $0x38] sm:$0xff]  ;;  %v562_v22 = vld [vmem:[%s1691_s3 + $0x30] sm:$0xff]  ;;  %v561_v23 = vld [vmem:[%s1691_s3 + $0x28] sm:$0xff] }
   0x9   :  { %923 = vmatpush.msrb.mxu3 %v570_v12  ;;  %v31_v24 = vld [vmem:[%s1689_s0 + $0x58] sm:$0xff]  ;;  %v560_v25 = vld [vmem:[%s1691_s3 + $0x20] sm:$0xff]  ;;  %v558_v27 = vld [vmem:[%s1691_s3 + $0x10] sm:$0xff] }
   0xa   :  { %578 = vmatpush.msra.mxu1 %v569_v13  ;;  %924 = vmatpush.msra.mxu2 %v569_v13  ;;  %v559_v26 = vld [vmem:[%s1691_s3 + $0x18] sm:$0xff]  ;;  %v32_v28 = vld [vmem:[%s1689_s0 + $0x60] sm:$0xff]  ;;  %v557_v29 = vld [vmem:[%s1691_s3 + $0x8] sm:$0xff] }
   0xb   :  { %925 = vmatpush.msrb.mxu3 %v569_v13  ;;  %v556_v30 = vld [vmem:[%s1691_s3] sm:$0xff]  ;;  %v33_v31 = vld [vmem:[%s1689_s0 + $0x68] sm:$0xff]  ;;  %v34_v32 = vld [vmem:[%s1689_s0 + $0x70] sm:$0xff] }
   0xc   :  { %579 = vmatpush.msra.mxu1 %v568_v15  ;;  %926 = vmatpush.msra.mxu2 %v568_v15  ;;  %v35_v33 = vld [vmem:[%s1689_s0 + $0x78] sm:$0xff]  ;;  %v1105_v34 = vld [vmem:[%s1690_s2] ss:$0 sm:$0xff]  ;;  %v37_v40 = vld [vmem:[%s1689_s0 + $0x88] sm:$0xff] }
   0xd   :  { %855 = vmatmul.msk.f32.gmra.mxu0 %vm90_vm0, %v21_v3  ;;  %927 = vmatpush.msrb.mxu3 %v568_v15  ;;  %v36_v36 = vld [vmem:[%s1689_s0 + $0x80] sm:$0xff]  ;;  %v38_v44 = vld [vmem:[%s1689_s0 + $0x90] sm:$0xff]  ;;  %v39_v48 = vld [vmem:[%s1689_s0 + $0x98] sm:$0xff] }
   0xe   :  { %580 = vmatpush.msra.mxu1 %v567_v16  ;;  %928 = vmatpush.msra.mxu2 %v567_v16  ;;  %v40_v52 = vld [vmem:[%s1689_s0 + $0xa0] sm:$0xff]  ;;  %v41_v56 = vld [vmem:[%s1689_s0 + $0xa8] sm:$0xff]  ;;  %v42_v60 = vld [vmem:[%s1689_s0 + $0xb0] sm:$0xff] }
   0xf   :  { %929 = vmatpush.msrb.mxu3 %v567_v16  ;;  %v43_v0 = vld [vmem:[%s1689_s0 + $0xb8] sm:$0xff]  ;;  %v46_v12 = vld [vmem:[%s1689_s0 + $0xd0] sm:$0xff] }
  0x10   :  { %581 = vmatpush.msra.mxu1 %v566_v17  ;;  %930 = vmatpush.msra.mxu2 %v566_v17  ;;  %v47_v16 = vld [vmem:[%s1689_s0 + $0xd8] sm:$0xff] }
  0x11   :  { %931 = vmatpush.msrb.mxu3 %v566_v17 }
  0x12   :  { %582 = vmatpush.msra.mxu1 %v565_v18  ;;  %932 = vmatpush.msra.mxu2 %v565_v18 }
  0x13   :  { %933 = vmatpush.msrb.mxu3 %v565_v18 }
  0x14   :  { %583 = vmatpush.msra.mxu1 %v564_v20  ;;  %934 = vmatpush.msra.mxu2 %v564_v20 }
  0x15   :  { %856 = vmatmul.msk.f32.gmra.mxu0 %vm90_vm0, %v22_v4  ;;  %935 = vmatpush.msrb.mxu3 %v564_v20  ;;  %v44_v4 = vld [vmem:[%s1689_s0 + $0xc0] sm:$0xff] }
  0x16   :  { %584 = vmatpush.msra.mxu1 %v563_v21  ;;  %936 = vmatpush.msra.mxu2 %v563_v21 }
  0x17   :  { %937 = vmatpush.msrb.mxu3 %v563_v21  ;;  %v48_v21 = vld [vmem:[%s1689_s0 + $0xe0] sm:$0xff] }
  0x18   :  { %585 = vmatpush.msra.mxu1 %v562_v22  ;;  %938 = vmatpush.msra.mxu2 %v562_v22 }
  0x19   :  { %939 = vmatpush.msrb.mxu3 %v562_v22 }
  0x1a   :  { %586 = vmatpush.msra.mxu1 %v561_v23  ;;  %940 = vmatpush.msra.mxu2 %v561_v23 }
  0x1b   :  { %941 = vmatpush.msrb.mxu3 %v561_v23 }
  0x1c   :  { %587 = vmatpush.msra.mxu1 %v560_v25  ;;  %942 = vmatpush.msra.mxu2 %v560_v25 }
  0x1d   :  { %857 = vmatmul.msk.f32.gmra.mxu0 %vm90_vm0, %v23_v5  ;;  %943 = vmatpush.msrb.mxu3 %v560_v25 }
  0x1e   :  { %588 = vmatpush.msra.mxu1 %v559_v26  ;;  %944 = vmatpush.msra.mxu2 %v559_v26 }
  0x1f   :  { %945 = vmatpush.msrb.mxu3 %v559_v26  ;;  %v49_v26 = vld [vmem:[%s1689_s0 + $0xe8] sm:$0xff] }
  0x20   :  { %589 = vmatpush.msra.mxu1 %v558_v27  ;;  %946 = vmatpush.msra.mxu2 %v558_v27 }
  0x21   :  { %947 = vmatpush.msrb.mxu3 %v558_v27 }
  0x22   :  { %590 = vmatpush.msra.mxu1 %v557_v29  ;;  %948 = vmatpush.msra.mxu2 %v557_v29 }
  0x23   :  { %949 = vmatpush.msrb.mxu3 %v557_v29  ;;  %v56_v29 = vld [vmem:[%s1689_s0 + $0x120] sm:$0xff] }
  0x24   :  { %591 = vmatpush.msra.mxu1 %v556_v30  ;;  %950 = vmatpush.msra.mxu2 %v556_v30 }
  0x25   :  { %858 = vmatmul.msk.f32.gmra.mxu0 %vm90_vm0, %v24_v6  ;;  %951 = vmatpush.msrb.mxu3 %v556_v30 }
  0x2d   :  { %859 = vmatmul.msk.f32.gmra.mxu0 %vm90_vm0, %v25_v7 }
  0x35   :  { %860 = vmatmul.msk.f32.gmra.mxu0 %vm90_vm0, %v26_v8  ;;  %v45_v8 = vld [vmem:[%s1689_s0 + $0xc8] sm:$0xff] }
  0x3d   :  { %861 = vmatmul.msk.f32.gmra.mxu0 %vm90_vm0, %v27_v9 }
  0x45   :  { %862 = vmatmul.msk.f32.gmra.mxu0 %vm90_vm0, %v28_v10 }
  0x4d   :  { %863 = vmatmul.msk.f32.gmra.mxu0 %vm90_vm0, %v29_v14 }
  0x55   :  { %864 = vmatmul.msk.f32.gmra.mxu0 %vm90_vm0, %v30_v19  ;;  %v54_v19 = vld [vmem:[%s1689_s0 + $0x110] sm:$0xff] }
  0x56   :  { %888 = vmatmul.msk.f32.vlgmr.msra.gmra.mxu3 %vm90_vm0, %v54_v19 }
  0x5d   :  { %865 = vmatmul.msk.f32.gmra.mxu0 %vm90_vm0, %v31_v24  ;;  %v55_v24 = vld [vmem:[%s1689_s0 + $0x118] sm:$0xff] }
  0x5e   :  { %889 = vmatmul.msk.f32.gmra.mxu3 %vm90_vm0, %v55_v24 }
  0x65   :  { %866 = vmatmul.msk.f32.gmra.mxu0 %vm90_vm0, %v32_v28 }
  0x66   :  { %890 = vmatmul.msk.f32.gmra.mxu3 %vm90_vm0, %v56_v29 }
  0x6d   :  { %867 = vmatmul.msk.f32.gmra.mxu0 %vm90_vm0, %v33_v31  ;;  %v50_v31 = vld [vmem:[%s1689_s0 + $0xf0] sm:$0xff] }
  0x75   :  { %868 = vmatmul.msk.f32.gmra.mxu0 %vm90_vm0, %v34_v32 }
  0x7d   :  { %869 = vmatmul.msk.f32.gmra.mxu0 %vm90_vm0, %v35_v33 }
  0x82   :  { %v300_v35 = vpop.f32.mrf.mxu0 }
  0x83   :  { %v301_v37 = vadd.f32 %v1105_v34, %v300_v35  ;;  %v57_v35 = vld [vmem:[%s1689_s0 + $0x128] sm:$0xff] }
  0x84   :  { %891 = vmatmul.msk.f32.gmra.mxu3 %vm90_vm0, %v57_v35 }
  0x85   :  { %870 = vmatmul.msk.f32.gmra.mxu0 %vm90_vm0, %v36_v36  ;;  %v492_v38 = vmax.f32 %v301_v37, 0.0  ;;  %v51_v37 = vld [vmem:[%s1689_s0 + $0xf8] sm:$0xff] }
  0x87   :  { %592 = vmatmul.f32.vlgmr.msra.gmra.mxu1 %v492_v38 }
  0x8a   :  { %v303_v39 = vpop.f32.mrf.mxu0 }
  0x8b   :  { %v304_v41 = vadd.f32 %v1105_v34, %v303_v39 }
  0x8d   :  { %871 = vmatmul.msk.f32.gmra.mxu0 %vm90_vm0, %v37_v40  ;;  %v493_v42 = vmax.f32 %v304_v41, 0.0  ;;  %v58_v40 = vld [vmem:[%s1689_s0 + $0x130] sm:$0xff]  ;;  %v1210_v41 = vld [vmem:[%s1692_s4] ss:$0 sm:$0xff] }
  0x8e   :  { %892 = vmatmul.msk.f32.gmra.mxu3 %vm90_vm0, %v58_v40  ;;  %v68_v40 = vld [vmem:[%s1689_s0 + $0x180] sm:$0xff] }
  0x8f   :  { %595 = vmatmul.f32.gmra.mxu1 %v493_v42 }
  0x92   :  { %v306_v43 = vpop.f32.mrf.mxu0 }
  0x93   :  { %v307_v45 = vadd.f32 %v1105_v34, %v306_v43  ;;  %v52_v43 = vld [vmem:[%s1689_s0 + $0x100] sm:$0xff] }
  0x95   :  { %872 = vmatmul.msk.f32.gmra.mxu0 %vm90_vm0, %v38_v44  ;;  %v494_v46 = vmax.f32 %v307_v45, 0.0 }
  0x97   :  { %598 = vmatmul.f32.gmra.mxu1 %v494_v46 }
  0x9a   :  { %v309_v47 = vpop.f32.mrf.mxu0 }
  0x9b   :  { %v310_v49 = vadd.f32 %v1105_v34, %v309_v47 }
  0x9d   :  { %873 = vmatmul.msk.f32.gmra.mxu0 %vm90_vm0, %v39_v48  ;;  %v495_v50 = vmax.f32 %v310_v49, 0.0  ;;  %v59_v48 = vld [vmem:[%s1689_s0 + $0x138] sm:$0xff] }
  0x9e   :  { %893 = vmatmul.msk.f32.gmra.mxu3 %vm90_vm0, %v59_v48 }
  0x9f   :  { %601 = vmatmul.f32.gmra.mxu1 %v495_v50  ;;  %v53_v50 = vld [vmem:[%s1689_s0 + $0x108] sm:$0xff] }
  0xa2   :  { %v312_v51 = vpop.f32.mrf.mxu0 }
  0xa3   :  { %v313_v53 = vadd.f32 %v1105_v34, %v312_v51 }
  0xa5   :  { %874 = vmatmul.msk.f32.gmra.mxu0 %vm90_vm0, %v40_v52  ;;  %v496_v54 = vmax.f32 %v313_v53, 0.0 }
  0xa7   :  { %604 = vmatmul.f32.gmra.mxu1 %v496_v54 }
  0xaa   :  { %v315_v55 = vpop.f32.mrf.mxu0 }
  0xab   :  { %v316_v57 = vadd.f32 %v1105_v34, %v315_v55  ;;  %v60_v55 = vld [vmem:[%s1689_s0 + $0x140] sm:$0xff] }
  0xac   :  { %894 = vmatmul.msk.f32.gmra.mxu3 %vm90_vm0, %v60_v55 }
  0xad   :  { %875 = vmatmul.msk.f32.gmra.mxu0 %vm90_vm0, %v41_v56  ;;  %v497_v58 = vmax.f32 %v316_v57, 0.0 }
  0xaf   :  { %607 = vmatmul.f32.gmra.mxu1 %v497_v58 }
  0xb2   :  { %v318_v59 = vpop.f32.mrf.mxu0 }
  0xb3   :  { %v319_v61 = vadd.f32 %v1105_v34, %v318_v59 }
  0xb5   :  { %876 = vmatmul.msk.f32.gmra.mxu0 %vm90_vm0, %v42_v60  ;;  %v498_v62 = vmax.f32 %v319_v61, 0.0  ;;  %v61_v61 = vld [vmem:[%s1689_s0 + $0x148] sm:$0xff] }
  0xb6   :  { %895 = vmatmul.msk.f32.gmra.mxu3 %vm90_vm0, %v61_v61 }
  0xb7   :  { %610 = vmatmul.f32.gmra.mxu1 %v498_v62 }
  0xba   :  { %v321_v63 = vpop.f32.mrf.mxu0 }
  0xbb   :  { %v322_v1 = vadd.f32 %v1105_v34, %v321_v63 }
  0xbd   :  { %877 = vmatmul.msk.f32.gmra.mxu0 %vm90_vm0, %v43_v0  ;;  %v499_v2 = vmax.f32 %v322_v1, 0.0 }
  0xbf   :  { %613 = vmatmul.f32.gmra.mxu1 %v499_v2 }
  0xc2   :  { %v324_v3 = vpop.f32.mrf.mxu0 }
  0xc3   :  { %v325_v5 = vadd.f32 %v1105_v34, %v324_v3  ;;  %v62_v3 = vld [vmem:[%s1689_s0 + $0x150] sm:$0xff] }
  0xc4   :  { %896 = vmatmul.msk.f32.gmra.mxu3 %vm90_vm0, %v62_v3  ;;  %v72_v3 = vld [vmem:[%s1689_s0 + $0x1a0] sm:$0xff] }
  0xc5   :  { %878 = vmatmul.msk.f32.gmra.mxu0 %vm90_vm0, %v44_v4  ;;  %v500_v6 = vmax.f32 %v325_v5, 0.0 }
  0xc7   :  { %616 = vmatmul.f32.gmra.mxu1 %v500_v6 }
  0xca   :  { %v327_v7 = vpop.f32.mrf.mxu0 }
  0xcb   :  { %v328_v9 = vadd.f32 %v1105_v34, %v327_v7 }
  0xcd   :  { %879 = vmatmul.msk.f32.gmra.mxu0 %vm90_vm0, %v45_v8  ;;  %v501_v10 = vmax.f32 %v328_v9, 0.0  ;;  %v63_v9 = vld [vmem:[%s1689_s0 + $0x158] sm:$0xff] }
  0xce   :  { %897 = vmatmul.msk.f32.gmra.mxu3 %vm90_vm0, %v63_v9 }
  0xcf   :  { %619 = vmatmul.f32.gmra.mxu1 %v501_v10 }
  0xd2   :  { %v330_v11 = vpop.f32.mrf.mxu0 }
  0xd3   :  { %v331_v13 = vadd.f32 %v1105_v34, %v330_v11 }
  0xd5   :  { %v502_v14 = vmax.f32 %v331_v13, 0.0  ;;  %880 = vmatmul.msk.f32.gmra.mxu0 %vm90_vm0, %v46_v12 }
  0xd7   :  { %622 = vmatmul.f32.gmra.mxu1 %v502_v14 }
  0xd9   :  { %v402_v55 = vpop.f32.mrf.mxu3 }
  0xda   :  { %v333_v15 = vpop.f32.mrf.mxu0 }
  0xdb   :  { %v334_v17 = vadd.f32 %v1105_v34, %v333_v15  ;;  %v64_v15 = vld [vmem:[%s1689_s0 + $0x160] sm:$0xff] }
  0xdc   :  { %898 = vmatmul.msk.f32.gmra.mxu3 %vm90_vm0, %v64_v15 }
  0xdd   :  { %v503_v18 = vmax.f32 %v334_v17, 0.0  ;;  %881 = vmatmul.msk.f32.gmra.mxu0 %vm90_vm0, %v47_v16 }
  0xdf   :  { %625 = vmatmul.f32.gmra.mxu1 %v503_v18 }
  0xe2   :  { %v336_v20 = vpop.f32.mrf.mxu0 }
  0xe3   :  { %v337_v22 = vadd.f32 %v1105_v34, %v336_v20 }
  0xe5   :  { %v504_v23 = vmax.f32 %v337_v22, 0.0  ;;  %882 = vmatmul.msk.f32.gmra.mxu0 %vm90_vm0, %v48_v21  ;;  %v65_v21 = vld [vmem:[%s1689_s0 + $0x168] sm:$0xff] }
  0xe6   :  { %899 = vmatmul.msk.f32.gmra.mxu3 %vm90_vm0, %v65_v21 }
  0xe7   :  { %628 = vmatmul.f32.gmra.mxu1 %v504_v23 }
  0xea   :  { %v339_v25 = vpop.f32.mrf.mxu0 }
  0xeb   :  { %v340_v27 = vadd.f32 %v1105_v34, %v339_v25 }
  0xed   :  { %v505_v28 = vmax.f32 %v340_v27, 0.0  ;;  %883 = vmatmul.msk.f32.gmra.mxu0 %vm90_vm0, %v49_v26  ;;  %v66_v27 = vld [vmem:[%s1689_s0 + $0x170] sm:$0xff] }
  0xee   :  { %900 = vmatmul.msk.f32.gmra.mxu3 %vm90_vm0, %v66_v27 }
  0xef   :  { %631 = vmatmul.f32.gmra.mxu1 %v505_v28 }
  0xf2   :  { %v342_v30 = vpop.f32.mrf.mxu0 }
  0xf3   :  { %v343_v32 = vadd.f32 %v1105_v34, %v342_v30 }
  0xf5   :  { %v506_v33 = vmax.f32 %v343_v32, 0.0  ;;  %884 = vmatmul.msk.f32.gmra.mxu0 %vm90_vm0, %v50_v31 }
  0xf7   :  { %634 = vmatmul.f32.gmra.mxu1 %v506_v33  ;;  %v67_v33 = vld [vmem:[%s1689_s0 + $0x178] sm:$0xff] }
  0xf8   :  { %901 = vmatmul.msk.f32.gmra.mxu3 %vm90_vm0, %v67_v33 }
  0xfa   :  { %v345_v36 = vpop.f32.mrf.mxu0 }
  0xfb   :  { %v346_v38 = vadd.f32 %v1105_v34, %v345_v36 }
  0xfd   :  { %v507_v39 = vmax.f32 %v346_v38, 0.0  ;;  %885 = vmatmul.msk.f32.gmra.mxu0 %vm90_vm0, %v51_v37 }
  0xff   :  { %637 = vmatmul.f32.gmra.mxu1 %v507_v39 }
 0x100   :  { %902 = vmatmul.msk.f32.gmra.mxu3 %vm90_vm0, %v68_v40 }
 0x102   :  { %v348_v42 = vpop.f32.mrf.mxu0 }
 0x103   :  { %v349_v44 = vadd.f32 %v1105_v34, %v348_v42 }
 0x104   :  { %v593_v45 = vpop.f32.mrf.mxu1 }
 0x105   :  { %v508_v46 = vmax.f32 %v349_v44, 0.0  ;;  %v594_v47 = vadd.f32 %v1210_v41, %v593_v45  ;;  %886 = vmatmul.msk.f32.gmra.mxu0 %vm90_vm0, %v52_v43 }
 0x107   :  { %786 = vst.msk [vmem:[%s1693_s5] sm:$0xff] %vm785_vm1, %v594_v47  ;;  %640 = vmatmul.f32.gmra.mxu1 %v508_v46  ;;  %v69_v47 = vld [vmem:[%s1689_s0 + $0x188] sm:$0xff] }
 0x108   :  { %903 = vmatmul.msk.f32.gmra.mxu3 %vm90_vm0, %v69_v47 }
 0x10a   :  { %v351_v49 = vpop.f32.mrf.mxu0 }
 0x10b   :  { %v352_v51 = vadd.f32 %v1105_v34, %v351_v49 }
 0x10c   :  { %v596_v52 = vpop.f32.mrf.mxu1 }
 0x10d   :  { %v509_v53 = vmax.f32 %v352_v51, 0.0  ;;  %v597_v54 = vadd.f32 %v1210_v41, %v596_v52  ;;  %887 = vmatmul.msk.f32.gmra.mxu0 %vm90_vm0, %v53_v50 }
 0x10f   :  { %787 = vst.msk [vmem:[%s1693_s5 + $0x8] sm:$0xff] %vm785_vm1, %v597_v54  ;;  %643 = vmatmul.f32.gmra.mxu1 %v509_v53  ;;  %v70_v53 = vld [vmem:[%s1689_s0 + $0x190] sm:$0xff] }
 0x110   :  { %904 = vmatmul.msk.f32.gmra.mxu3 %vm90_vm0, %v70_v53 }
 0x112   :  { %v354_v56 = vpop.f32.mrf.mxu0 }
 0x113   :  { %v355_v57 = vadd.f32 %v1105_v34, %v354_v56 }
 0x114   :  { %v599_v58 = vpop.f32.mrf.mxu1 }
 0x115   :  { %v510_v59 = vmax.f32 %v355_v57, 0.0  ;;  %v600_v60 = vadd.f32 %v1210_v41, %v599_v58 }
 0x117   :  { %788 = vst.msk [vmem:[%s1693_s5 + $0x10] sm:$0xff] %vm785_vm1, %v600_v60  ;;  %646 = vmatmul.f32.gmra.mxu1 %v510_v59  ;;  %v71_v60 = vld [vmem:[%s1689_s0 + $0x198] sm:$0xff] }
 0x118   :  { %905 = vmatmul.msk.f32.gmra.mxu3 %vm90_vm0, %v71_v60 }
 0x11a   :  { %v357_v62 = vpop.f32.mrf.mxu0 }
 0x11b   :  { %v358_v63 = vadd.f32 %v1105_v34, %v357_v62  ;;  %v405_v62 = vpop.f32.mrf.mxu3 }
 0x11c   :  { %v602_v0 = vpop.f32.mrf.mxu1 }
 0x11d   :  { %v511_v1 = vmax.f32 %v358_v63, 0.0  ;;  %v603_v2 = vadd.f32 %v1210_v41, %v602_v0 }
 0x11f   :  { %789 = vst.msk [vmem:[%s1693_s5 + $0x18] sm:$0xff] %vm785_vm1, %v603_v2  ;;  %649 = vmatmul.f32.gmra.mxu1 %v511_v1 }
 0x120   :  { %906 = vmatmul.msk.f32.gmra.mxu3 %vm90_vm0, %v72_v3 }
 0x122   :  { %v360_v4 = vpop.f32.mrf.mxu0 }
 0x123   :  { %v361_v5 = vadd.f32 %v1105_v34, %v360_v4 }
 0x124   :  { %v605_v6 = vpop.f32.mrf.mxu1 }
 0x125   :  { %v512_v7 = vmax.f32 %v361_v5, 0.0  ;;  %v606_v8 = vadd.f32 %v1210_v41, %v605_v6  ;;  %v408_v5 = vpop.f32.mrf.mxu3 }
 0x127   :  { %790 = vst.msk [vmem:[%s1693_s5 + $0x20] sm:$0xff] %vm785_vm1, %v606_v8  ;;  %652 = vmatmul.f32.gmra.mxu1 %v512_v7 }
 0x12a   :  { %v363_v10 = vpop.f32.mrf.mxu0 }
 0x12b   :  { %v364_v11 = vadd.f32 %v1105_v34, %v363_v10  ;;  %v73_v10 = vld [vmem:[%s1689_s0 + $0x1a8] sm:$0xff] }
 0x12c   :  { %v608_v12 = vpop.f32.mrf.mxu1  ;;  %907 = vmatmul.msk.f32.gmra.mxu3 %vm90_vm0, %v73_v10 }
 0x12d   :  { %v513_v13 = vmax.f32 %v364_v11, 0.0  ;;  %v609_v14 = vadd.f32 %v1210_v41, %v608_v12  ;;  %v411_v12 = vpop.f32.mrf.mxu3 }
 0x12f   :  { %791 = vst.msk [vmem:[%s1693_s5 + $0x28] sm:$0xff] %vm785_vm1, %v609_v14  ;;  %655 = vmatmul.f32.gmra.mxu1 %v513_v13 }
 0x132   :  { %v366_v16 = vpop.f32.mrf.mxu0 }
 0x133   :  { %v367_v17 = vadd.f32 %v1105_v34, %v366_v16 }
 0x134   :  { %v611_v18 = vpop.f32.mrf.mxu1 }
 0x135   :  { %v514_v19 = vmax.f32 %v367_v17, 0.0  ;;  %v612_v20 = vadd.f32 %v1210_v41, %v611_v18  ;;  %v74_v17 = vld [vmem:[%s1689_s0 + $0x1b0] sm:$0xff] }
 0x136   :  { %908 = vmatmul.msk.f32.gmra.mxu3 %vm90_vm0, %v74_v17 }
 0x137   :  { %792 = vst.msk [vmem:[%s1693_s5 + $0x30] sm:$0xff] %vm785_vm1, %v612_v20  ;;  %658 = vmatmul.f32.gmra.mxu1 %v514_v19  ;;  %v414_v19 = vpop.f32.mrf.mxu3 }
 0x13a   :  { %v369_v22 = vpop.f32.mrf.mxu0 }
 0x13b   :  { %v370_v23 = vadd.f32 %v1105_v34, %v369_v22 }
 0x13c   :  { %v614_v24 = vpop.f32.mrf.mxu1 }
 0x13d   :  { %v515_v25 = vmax.f32 %v370_v23, 0.0  ;;  %v615_v26 = vadd.f32 %v1210_v41, %v614_v24  ;;  %v75_v24 = vld [vmem:[%s1689_s0 + $0x1b8] sm:$0xff] }
 0x13e   :  { %909 = vmatmul.msk.f32.gmra.mxu3 %vm90_vm0, %v75_v24 }
 0x13f   :  { %793 = vst.msk [vmem:[%s1693_s5 + $0x38] sm:$0xff] %vm785_vm1, %v615_v26  ;;  %661 = vmatmul.f32.gmra.mxu1 %v515_v25  ;;  %v417_v26 = vpop.f32.mrf.mxu3 }
 0x142   :  { %v372_v28 = vpop.f32.mrf.mxu0 }
 0x143   :  { %v373_v29 = vadd.f32 %v1105_v34, %v372_v28 }
 0x144   :  { %v617_v30 = vpop.f32.mrf.mxu1 }
 0x145   :  { %v516_v31 = vmax.f32 %v373_v29, 0.0  ;;  %v618_v32 = vadd.f32 %v1210_v41, %v617_v30 }
 0x147   :  { %794 = vst.msk [vmem:[%s1693_s5 + $0x40] sm:$0xff] %vm785_vm1, %v618_v32  ;;  %664 = vmatmul.f32.gmra.mxu1 %v516_v31  ;;  %v76_v31 = vld [vmem:[%s1689_s0 + $0x1c0] sm:$0xff]  ;;  %v403_v32 = vadd.f32 %v1105_v34, %v402_v55  ;;  %v420_v33 = vpop.f32.mrf.mxu3 }
 0x148   :  { %910 = vmatmul.msk.f32.gmra.mxu3 %vm90_vm0, %v76_v31 }
 0x14a   :  { %v375_v35 = vpop.f32.mrf.mxu0 }
 0x14b   :  { %v376_v36 = vadd.f32 %v1105_v34, %v375_v35 }
 0x14c   :  { %v620_v37 = vpop.f32.mrf.mxu1 }
 0x14d   :  { %v517_v38 = vmax.f32 %v376_v36, 0.0  ;;  %v621_v39 = vadd.f32 %v1210_v41, %v620_v37  ;;  %v526_v37 = vmax.f32 %v403_v32, 0.0 }
 0x14f   :  { %795 = vst.msk [vmem:[%s1693_s5 + $0x48] sm:$0xff] %vm785_vm1, %v621_v39  ;;  %667 = vmatmul.f32.gmra.mxu1 %v517_v38  ;;  %v77_v38 = vld [vmem:[%s1689_s0 + $0x1c8] sm:$0xff]  ;;  %v406_v39 = vadd.f32 %v1105_v34, %v405_v62  ;;  %v423_v40 = vpop.f32.mrf.mxu3 }
 0x150   :  { %911 = vmatmul.msk.f32.gmra.mxu3 %vm90_vm0, %v77_v38 }
 0x152   :  { %v378_v42 = vpop.f32.mrf.mxu0 }
 0x153   :  { %v379_v43 = vadd.f32 %v1105_v34, %v378_v42 }
 0x154   :  { %v623_v44 = vpop.f32.mrf.mxu1 }
 0x155   :  { %v518_v45 = vmax.f32 %v379_v43, 0.0  ;;  %v624_v46 = vadd.f32 %v1210_v41, %v623_v44  ;;  %v527_v44 = vmax.f32 %v406_v39, 0.0 }
 0x157   :  { %796 = vst.msk [vmem:[%s1693_s5 + $0x50] sm:$0xff] %vm785_vm1, %v624_v46  ;;  %670 = vmatmul.f32.gmra.mxu1 %v518_v45  ;;  %v78_v45 = vld [vmem:[%s1689_s0 + $0x1d0] sm:$0xff]  ;;  %v409_v46 = vadd.f32 %v1105_v34, %v408_v5  ;;  %v426_v47 = vpop.f32.mrf.mxu3 }
 0x158   :  { %912 = vmatmul.msk.f32.gmra.mxu3 %vm90_vm0, %v78_v45  ;;  %v82_v5 = vld [vmem:[%s1689_s0 + $0x1f0] sm:$0xff]  ;;  %v427_v17 = vadd.f32 %v1105_v34, %v426_v47 }
 0x15a   :  { %v381_v48 = vpop.f32.mrf.mxu0 }
 0x15b   :  { %v382_v49 = vadd.f32 %v1105_v34, %v381_v48 }
 0x15c   :  { %v626_v50 = vpop.f32.mrf.mxu1 }
 0x15d   :  { %v519_v51 = vmax.f32 %v382_v49, 0.0  ;;  %v627_v52 = vadd.f32 %v1210_v41, %v626_v50  ;;  %v528_v50 = vmax.f32 %v409_v46, 0.0 }
 0x15f   :  { %797 = vst.msk [vmem:[%s1693_s5 + $0x58] sm:$0xff] %vm785_vm1, %v627_v52  ;;  %673 = vmatmul.f32.gmra.mxu1 %v519_v51  ;;  %v79_v51 = vld [vmem:[%s1689_s0 + $0x1d8] sm:$0xff]  ;;  %v412_v52 = vadd.f32 %v1105_v34, %v411_v12  ;;  %v429_v53 = vpop.f32.mrf.mxu3  ;;  %v424_v12 = vadd.f32 %v1105_v34, %v423_v40 }
 0x160   :  { %913 = vmatmul.msk.f32.gmra.mxu3 %vm90_vm0, %v79_v51 }
 0x162   :  { %v384_v54 = vpop.f32.mrf.mxu0 }
 0x163   :  { %v385_v56 = vadd.f32 %v1105_v34, %v384_v54 }
 0x164   :  { %v629_v57 = vpop.f32.mrf.mxu1 }
 0x165   :  { %v520_v58 = vmax.f32 %v385_v56, 0.0  ;;  %v630_v59 = vadd.f32 %v1210_v41, %v629_v57  ;;  %v529_v56 = vmax.f32 %v412_v52, 0.0  ;;  %v80_v57 = vld [vmem:[%s1689_s0 + $0x1e0] sm:$0xff] }
 0x167   :  { %798 = vst.msk [vmem:[%s1693_s5 + $0x60] sm:$0xff] %vm785_vm1, %v630_v59  ;;  %676 = vmatmul.f32.gmra.mxu1 %v520_v58  ;;  %v415_v58 = vadd.f32 %v1105_v34, %v414_v19  ;;  %v432_v59 = vpop.f32.mrf.mxu3 }
 0x168   :  { %914 = vmatmul.msk.f32.gmra.mxu3 %vm90_vm0, %v80_v57 }
 0x169   :  { %v530_v62 = vmax.f32 %v415_v58, 0.0 }
 0x16a   :  { %v387_v61 = vpop.f32.mrf.mxu0 }
 0x16b   :  { %v388_v63 = vadd.f32 %v1105_v34, %v387_v61 }
 0x16c   :  { %v632_v0 = vpop.f32.mrf.mxu1 }
 0x16d   :  { %v521_v1 = vmax.f32 %v388_v63, 0.0  ;;  %v633_v2 = vadd.f32 %v1210_v41, %v632_v0  ;;  %v81_v63 = vld [vmem:[%s1689_s0 + $0x1e8] sm:$0xff]  ;;  %v418_v0 = vadd.f32 %v1105_v34, %v417_v26 }
 0x16f   :  { %799 = vst.msk [vmem:[%s1693_s5 + $0x68] sm:$0xff] %vm785_vm1, %v633_v2  ;;  %679 = vmatmul.f32.gmra.mxu1 %v521_v1  ;;  %v435_v1 = vpop.f32.mrf.mxu3 }
 0x170   :  { %915 = vmatmul.msk.f32.gmra.mxu3 %vm90_vm0, %v81_v63  ;;  %v436_v32 = vadd.f32 %v1105_v34, %v435_v1 }
 0x172   :  { %v390_v4 = vpop.f32.mrf.mxu0 }
 0x173   :  { %v391_v6 = vadd.f32 %v1105_v34, %v390_v4  ;;  %v531_v4 = vmax.f32 %v418_v0, 0.0 }
 0x174   :  { %v635_v7 = vpop.f32.mrf.mxu1 }
 0x175   :  { %v522_v8 = vmax.f32 %v391_v6, 0.0  ;;  %v636_v9 = vadd.f32 %v1210_v41, %v635_v7  ;;  %v421_v6 = vadd.f32 %v1105_v34, %v420_v33 }
 0x177   :  { %800 = vst.msk [vmem:[%s1693_s5 + $0x70] sm:$0xff] %vm785_vm1, %v636_v9  ;;  %682 = vmatmul.f32.gmra.mxu1 %v522_v8  ;;  %v438_v7 = vpop.f32.mrf.mxu3  ;;  %v532_v10 = vmax.f32 %v421_v6, 0.0 }
 0x178   :  { %916 = vmatmul.msk.f32.gmra.mxu3 %vm90_vm0, %v82_v5  ;;  %v439_v38 = vadd.f32 %v1105_v34, %v438_v7 }
 0x17a   :  { %v393_v11 = vpop.f32.mrf.mxu0 }
 0x17b   :  { %v394_v13 = vadd.f32 %v1105_v34, %v393_v11  ;;  %v83_v11 = vld [vmem:[%s1689_s0 + $0x1f8] sm:$0xff] }
 0x17c   :  { %v638_v14 = vpop.f32.mrf.mxu1 }
 0x17d   :  { %v523_v15 = vmax.f32 %v394_v13, 0.0  ;;  %v639_v16 = vadd.f32 %v1210_v41, %v638_v14 }
 0x17f   :  { %801 = vst.msk [vmem:[%s1693_s5 + $0x78] sm:$0xff] %vm785_vm1, %v639_v16  ;;  %685 = vmatmul.f32.vlgmr.msra.gmra.mxu2 %v523_v15  ;;  %v441_v13 = vpop.f32.mrf.mxu3  ;;  %v533_v16 = vmax.f32 %v424_v12, 0.0 }
 0x180   :  { %917 = vmatmul.msk.f32.gmra.mxu3 %vm90_vm0, %v83_v11 }
 0x182   :  { %v396_v18 = vpop.f32.mrf.mxu0 }
 0x183   :  { %v397_v20 = vadd.f32 %v1105_v34, %v396_v18 }
 0x184   :  { %v641_v21 = vpop.f32.mrf.mxu1 }
 0x185   :  { %v524_v22 = vmax.f32 %v397_v20, 0.0  ;;  %v642_v23 = vadd.f32 %v1210_v41, %v641_v21  ;;  %v534_v20 = vmax.f32 %v427_v17, 0.0 }
 0x187   :  { %802 = vst.msk [vmem:[%s1693_s5 + $0x80] sm:$0xff] %vm785_vm1, %v642_v23  ;;  %688 = vmatmul.f32.gmra.mxu2 %v524_v22  ;;  %v444_v18 = vpop.f32.mrf.mxu3  ;;  %v430_v22 = vadd.f32 %v1105_v34, %v429_v53 }
 0x188   :  { %v445_v47 = vadd.f32 %v1105_v34, %v444_v18 }
 0x18a   :  { %v399_v25 = vpop.f32.mrf.mxu0  ;;  %v540_v51 = vmax.f32 %v445_v47, 0.0 }
 0x18b   :  { %v400_v27 = vadd.f32 %v1105_v34, %v399_v25  ;;  %v535_v25 = vmax.f32 %v430_v22, 0.0 }
 0x18c   :  { %v644_v28 = vpop.f32.mrf.mxu1 }
 0x18d   :  { %v525_v29 = vmax.f32 %v400_v27, 0.0  ;;  %v645_v30 = vadd.f32 %v1210_v41, %v644_v28  ;;  %v433_v27 = vadd.f32 %v1105_v34, %v432_v59 }
 0x18f   :  { %803 = vst.msk [vmem:[%s1693_s5 + $0x88] sm:$0xff] %vm785_vm1, %v645_v30  ;;  %691 = vmatmul.f32.gmra.mxu2 %v525_v29  ;;  %v447_v23 = vpop.f32.mrf.mxu3  ;;  %v536_v30 = vmax.f32 %v433_v27, 0.0 }
 0x190   :  { %v448_v52 = vadd.f32 %v1105_v34, %v447_v23 }
 0x194   :  { %v647_v35 = vpop.f32.mrf.mxu1 }
 0x195   :  { %v648_v36 = vadd.f32 %v1210_v41, %v647_v35 }
 0x197   :  { %804 = vst.msk [vmem:[%s1693_s5 + $0x90] sm:$0xff] %vm785_vm1, %v648_v36  ;;  %694 = vmatmul.f32.gmra.mxu2 %v526_v37  ;;  %v450_v28 = vpop.f32.mrf.mxu3  ;;  %v537_v36 = vmax.f32 %v436_v32, 0.0 }
 0x198   :  { %v451_v57 = vadd.f32 %v1105_v34, %v450_v28 }
 0x19c   :  { %v650_v42 = vpop.f32.mrf.mxu1 }
 0x19d   :  { %v651_v43 = vadd.f32 %v1210_v41, %v650_v42  ;;  %v538_v42 = vmax.f32 %v439_v38, 0.0 }
 0x19f   :  { %805 = vst.msk [vmem:[%s1693_s5 + $0x98] sm:$0xff] %vm785_vm1, %v651_v43  ;;  %697 = vmatmul.f32.gmra.mxu2 %v527_v44  ;;  %v453_v33 = vpop.f32.mrf.mxu3  ;;  %v442_v44 = vadd.f32 %v1105_v34, %v441_v13 }
 0x1a1   :  { %v539_v46 = vmax.f32 %v442_v44, 0.0 }
 0x1a4   :  { %v653_v48 = vpop.f32.mrf.mxu1 }
 0x1a5   :  { %v654_v49 = vadd.f32 %v1210_v41, %v653_v48 }
 0x1a7   :  { %806 = vst.msk [vmem:[%s1693_s5 + $0xa0] sm:$0xff] %vm785_vm1, %v654_v49  ;;  %700 = vmatmul.f32.gmra.mxu2 %v528_v50  ;;  %v456_v39 = vpop.f32.mrf.mxu3 }
 0x1ac   :  { %v656_v54 = vpop.f32.mrf.mxu1 }
 0x1ad   :  { %v657_v55 = vadd.f32 %v1210_v41, %v656_v54 }
 0x1af   :  { %807 = vst.msk [vmem:[%s1693_s5 + $0xa8] sm:$0xff] %vm785_vm1, %v657_v55  ;;  %703 = vmatmul.f32.gmra.mxu2 %v529_v56  ;;  %v459_v45 = vpop.f32.mrf.mxu3  ;;  %v541_v56 = vmax.f32 %v448_v52, 0.0 }
 0x1b4   :  { %v659_v60 = vpop.f32.mrf.mxu1 }
 0x1b5   :  { %v660_v61 = vadd.f32 %v1210_v41, %v659_v60 }
 0x1b7   :  { %808 = vst.msk [vmem:[%s1693_s5 + $0xb0] sm:$0xff] %vm785_vm1, %v660_v61  ;;  %706 = vmatmul.f32.gmra.mxu2 %v530_v62  ;;  %v542_v61 = vmax.f32 %v451_v57, 0.0  ;;  %v454_v62 = vadd.f32 %v1105_v34, %v453_v33 }
 0x1b9   :  { %v462_v49 = vpop.f32.mrf.mxu3 }
 0x1ba   :  { %v463_v13 = vadd.f32 %v1105_v34, %v462_v49 }
 0x1bc   :  { %v662_v2 = vpop.f32.mrf.mxu1  ;;  %v546_v17 = vmax.f32 %v463_v13, 0.0 }
 0x1bd   :  { %v663_v3 = vadd.f32 %v1210_v41, %v662_v2  ;;  %v543_v2 = vmax.f32 %v454_v62, 0.0 }
 0x1bf   :  { %809 = vst.msk [vmem:[%s1693_s5 + $0xb8] sm:$0xff] %vm785_vm1, %v663_v3  ;;  %709 = vmatmul.f32.gmra.mxu2 %v531_v4  ;;  %v457_v3 = vadd.f32 %v1105_v34, %v456_v39 }
 0x1c1   :  { %v465_v54 = vpop.f32.mrf.mxu3  ;;  %v544_v7 = vmax.f32 %v457_v3, 0.0 }
 0x1c2   :  { %v466_v18 = vadd.f32 %v1105_v34, %v465_v54 }
 0x1c4   :  { %v665_v8 = vpop.f32.mrf.mxu1  ;;  %v547_v22 = vmax.f32 %v466_v18, 0.0 }
 0x1c5   :  { %v666_v9 = vadd.f32 %v1210_v41, %v665_v8  ;;  %v460_v8 = vadd.f32 %v1105_v34, %v459_v45 }
 0x1c7   :  { %810 = vst.msk [vmem:[%s1693_s5 + $0xc0] sm:$0xff] %vm785_vm1, %v666_v9  ;;  %712 = vmatmul.f32.gmra.mxu2 %v532_v10  ;;  %v545_v12 = vmax.f32 %v460_v8, 0.0 }
 0x1cb   :  { %v468_v59 = vpop.f32.mrf.mxu3 }
 0x1cc   :  { %v668_v14 = vpop.f32.mrf.mxu1  ;;  %v469_v23 = vadd.f32 %v1105_v34, %v468_v59 }
 0x1cd   :  { %v669_v15 = vadd.f32 %v1210_v41, %v668_v14 }
 0x1ce   :  { %v548_v28 = vmax.f32 %v469_v23, 0.0 }
 0x1cf   :  { %811 = vst.msk [vmem:[%s1693_s5 + $0xc8] sm:$0xff] %vm785_vm1, %v669_v15  ;;  %715 = vmatmul.f32.gmra.mxu2 %v533_v16 }
 0x1d3   :  { %v471_v0 = vpop.f32.mrf.mxu3 }
 0x1d4   :  { %v671_v19 = vpop.f32.mrf.mxu1 }
 0x1d5   :  { %v672_v21 = vadd.f32 %v1210_v41, %v671_v19 }
 0x1d7   :  { %812 = vst.msk [vmem:[%s1693_s5 + $0xd0] sm:$0xff] %vm785_vm1, %v672_v21  ;;  %718 = vmatmul.f32.gmra.mxu2 %v534_v20 }
 0x1db   :  { %v474_v5 = vpop.f32.mrf.mxu3 }
 0x1dc   :  { %v674_v24 = vpop.f32.mrf.mxu1  ;;  %v475_v38 = vadd.f32 %v1105_v34, %v474_v5 }
 0x1dd   :  { %v675_v26 = vadd.f32 %v1210_v41, %v674_v24 }
 0x1df   :  { %813 = vst.msk [vmem:[%s1693_s5 + $0xd8] sm:$0xff] %vm785_vm1, %v675_v26  ;;  %721 = vmatmul.f32.gmra.mxu2 %v535_v25 }
 0x1e3   :  { %v477_v10 = vpop.f32.mrf.mxu3 }
 0x1e4   :  { %v677_v29 = vpop.f32.mrf.mxu1 }
 0x1e5   :  { %v678_v31 = vadd.f32 %v1210_v41, %v677_v29 }
 0x1e7   :  { %814 = vst.msk [vmem:[%s1693_s5 + $0xe0] sm:$0xff] %vm785_vm1, %v678_v31  ;;  %724 = vmatmul.f32.gmra.mxu2 %v536_v30  ;;  %v472_v30 = vadd.f32 %v1105_v34, %v471_v0 }
 0x1eb   :  { %v480_v15 = vpop.f32.mrf.mxu3 }
 0x1ec   :  { %v680_v35 = vpop.f32.mrf.mxu1  ;;  %v481_v47 = vadd.f32 %v1105_v34, %v480_v15 }
 0x1ed   :  { %v681_v37 = vadd.f32 %v1210_v41, %v680_v35 }
 0x1ef   :  { %815 = vst.msk [vmem:[%s1693_s5 + $0xe8] sm:$0xff] %vm785_vm1, %v681_v37  ;;  %727 = vmatmul.f32.gmra.mxu2 %v537_v36  ;;  %v549_v36 = vmax.f32 %v472_v30, 0.0 }
 0x1f3   :  { %v483_v20 = vpop.f32.mrf.mxu3 }
 0x1f4   :  { %v683_v40 = vpop.f32.mrf.mxu1 }
 0x1f5   :  { %v684_v43 = vadd.f32 %v1210_v41, %v683_v40 }
 0x1f7   :  { %816 = vst.msk [vmem:[%s1693_s5 + $0xf0] sm:$0xff] %vm785_vm1, %v684_v43  ;;  %730 = vmatmul.f32.gmra.mxu2 %v538_v42  ;;  %v550_v42 = vmax.f32 %v475_v38, 0.0  ;;  %v478_v43 = vadd.f32 %v1105_v34, %v477_v10 }
 0x1fb   :  { %v486_v25 = vpop.f32.mrf.mxu3 }
 0x1fc   :  { %v487_v27 = vadd.f32 %v1105_v34, %v486_v25 }
 0x1fe   :  { %v554_v29 = vmax.f32 %v487_v27, 0.0 }
 0x1ff   :  { %733 = vmatmul.f32.gmra.mxu2 %v539_v46  ;;  %v551_v46 = vmax.f32 %v478_v43, 0.0 }
 0x200   :  { %778 = vmatmul.f32.vlgmr.msrb.gmra.mxu3 %v554_v29 }
 0x202   :  { %v686_v48 = vpop.f32.mrf.mxu2 }
 0x203   :  { %v687_v50 = vadd.f32 %v1210_v41, %v686_v48  ;;  %v489_v32 = vpop.f32.mrf.mxu3 }
 0x204   :  { %v490_v35 = vadd.f32 %v1105_v34, %v489_v32 }
 0x205   :  { %817 = vst.msk [vmem:[%s1693_s5 + $0xf8] sm:$0xff] %vm785_vm1, %v687_v50  ;;  %v552_v50 = vmax.f32 %v481_v47, 0.0 }
 0x206   :  { %v555_v37 = vmax.f32 %v490_v35, 0.0 }
 0x207   :  { %736 = vmatmul.f32.gmra.mxu2 %v540_v51  ;;  %v484_v51 = vadd.f32 %v1105_v34, %v483_v20 }
 0x208   :  { %781 = vmatmul.f32.gmra.mxu3 %v555_v37 }
 0x209   :  { %v553_v54 = vmax.f32 %v484_v51, 0.0 }
 0x20a   :  { %v689_v53 = vpop.f32.mrf.mxu2 }
 0x20b   :  { %v690_v55 = vadd.f32 %v1210_v41, %v689_v53 }
 0x20d   :  { %818 = vst.msk [vmem:[%s1693_s5 + $0x100] sm:$0xff] %vm785_vm1, %v690_v55 }
 0x20f   :  { %739 = vmatmul.f32.gmra.mxu2 %v541_v56 }
 0x212   :  { %v692_v58 = vpop.f32.mrf.mxu2 }
 0x213   :  { %v693_v60 = vadd.f32 %v1210_v41, %v692_v58 }
 0x215   :  { %819 = vst.msk [vmem:[%s1693_s5 + $0x108] sm:$0xff] %vm785_vm1, %v693_v60 }
 0x217   :  { %742 = vmatmul.f32.gmra.mxu2 %v542_v61 }
 0x21a   :  { %v695_v63 = vpop.f32.mrf.mxu2 }
 0x21b   :  { %v696_v1 = vadd.f32 %v1210_v41, %v695_v63 }
 0x21d   :  { %820 = vst.msk [vmem:[%s1693_s5 + $0x110] sm:$0xff] %vm785_vm1, %v696_v1 }
 0x21f   :  { %745 = vmatmul.f32.gmra.mxu2 %v543_v2 }
 0x222   :  { %v698_v4 = vpop.f32.mrf.mxu2 }
 0x223   :  { %v699_v6 = vadd.f32 %v1210_v41, %v698_v4 }
 0x225   :  { %821 = vst.msk [vmem:[%s1693_s5 + $0x118] sm:$0xff] %vm785_vm1, %v699_v6 }
 0x227   :  { %748 = vmatmul.f32.gmra.mxu2 %v544_v7 }
 0x22a   :  { %v701_v9 = vpop.f32.mrf.mxu2 }
 0x22b   :  { %v702_v11 = vadd.f32 %v1210_v41, %v701_v9 }
 0x22d   :  { %822 = vst.msk [vmem:[%s1693_s5 + $0x120] sm:$0xff] %vm785_vm1, %v702_v11 }
 0x22f   :  { %751 = vmatmul.f32.gmra.mxu2 %v545_v12 }
 0x232   :  { %v704_v14 = vpop.f32.mrf.mxu2 }
 0x233   :  { %v705_v16 = vadd.f32 %v1210_v41, %v704_v14 }
 0x235   :  { %823 = vst.msk [vmem:[%s1693_s5 + $0x128] sm:$0xff] %vm785_vm1, %v705_v16 }
 0x237   :  { %754 = vmatmul.f32.gmra.mxu2 %v546_v17 }
 0x23a   :  { %v707_v19 = vpop.f32.mrf.mxu2 }
 0x23b   :  { %v708_v21 = vadd.f32 %v1210_v41, %v707_v19 }
 0x23d   :  { %824 = vst.msk [vmem:[%s1693_s5 + $0x130] sm:$0xff] %vm785_vm1, %v708_v21 }
 0x23f   :  { %757 = vmatmul.f32.gmra.mxu2 %v547_v22 }
 0x242   :  { %v710_v24 = vpop.f32.mrf.mxu2 }
 0x243   :  { %v711_v26 = vadd.f32 %v1210_v41, %v710_v24 }
 0x245   :  { %825 = vst.msk [vmem:[%s1693_s5 + $0x138] sm:$0xff] %vm785_vm1, %v711_v26 }
 0x247   :  { %760 = vmatmul.f32.gmra.mxu2 %v548_v28 }
 0x24a   :  { %v713_v31 = vpop.f32.mrf.mxu2 }
 0x24b   :  { %v714_v33 = vadd.f32 %v1210_v41, %v713_v31 }
 0x24d   :  { %826 = vst.msk [vmem:[%s1693_s5 + $0x140] sm:$0xff] %vm785_vm1, %v714_v33 }
 0x24f   :  { %763 = vmatmul.f32.gmra.mxu2 %v549_v36 }
 0x252   :  { %v716_v39 = vpop.f32.mrf.mxu2 }
 0x253   :  { %v717_v40 = vadd.f32 %v1210_v41, %v716_v39 }
 0x255   :  { %827 = vst.msk [vmem:[%s1693_s5 + $0x148] sm:$0xff] %vm785_vm1, %v717_v40 }
 0x257   :  { %766 = vmatmul.f32.gmra.mxu2 %v550_v42 }
 0x25a   :  { %v719_v44 = vpop.f32.mrf.mxu2 }
 0x25b   :  { %v720_v45 = vadd.f32 %v1210_v41, %v719_v44 }
 0x25d   :  { %828 = vst.msk [vmem:[%s1693_s5 + $0x150] sm:$0xff] %vm785_vm1, %v720_v45 }
 0x25f   :  { %769 = vmatmul.f32.gmra.mxu2 %v551_v46 }
 0x262   :  { %v722_v48 = vpop.f32.mrf.mxu2 }
 0x263   :  { %v723_v49 = vadd.f32 %v1210_v41, %v722_v48 }
 0x265   :  { %829 = vst.msk [vmem:[%s1693_s5 + $0x158] sm:$0xff] %vm785_vm1, %v723_v49 }
 0x267   :  { %772 = vmatmul.f32.gmra.mxu2 %v552_v50 }
 0x26a   :  { %v725_v52 = vpop.f32.mrf.mxu2 }
 0x26b   :  { %v726_v53 = vadd.f32 %v1210_v41, %v725_v52 }
 0x26d   :  { %830 = vst.msk [vmem:[%s1693_s5 + $0x160] sm:$0xff] %vm785_vm1, %v726_v53 }
 0x26f   :  { %775 = vmatmul.f32.gmra.mxu2 %v553_v54 }
 0x272   :  { %v728_v55 = vpop.f32.mrf.mxu2 }
 0x273   :  { %v729_v56 = vadd.f32 %v1210_v41, %v728_v55 }
 0x275   :  { %831 = vst.msk [vmem:[%s1693_s5 + $0x168] sm:$0xff] %vm785_vm1, %v729_v56 }
 0x27a   :  { %v731_v57 = vpop.f32.mrf.mxu2 }
 0x27b   :  { %v732_v34 = vadd.f32 %v1210_v41, %v731_v57 }
 0x27d   :  { %832 = vst.msk [vmem:[%s1693_s5 + $0x170] sm:$0xff] %vm785_vm1, %v732_v34 }
 0x282   :  { %v734_v58 = vpop.f32.mrf.mxu2 }
 0x283   :  { %v735_v59 = vadd.f32 %v1210_v41, %v734_v58  ;;  %v779_v13 = vpop.f32.mrf.mxu3 }
 0x284   :  { %v780_v15 = vadd.f32 %v1210_v41, %v779_v13 }
 0x285   :  { %833 = vst.msk [vmem:[%s1693_s5 + $0x178] sm:$0xff] %vm785_vm1, %v735_v59 }
 0x286   :  { %848 = vst.msk [vmem:[%s1693_s5 + $0x1f0] sm:$0xff] %vm785_vm1, %v780_v15 }
 0x28a   :  { %v737_v60 = vpop.f32.mrf.mxu2 }
 0x28b   :  { %v738_v61 = vadd.f32 %v1210_v41, %v737_v60  ;;  %v782_v17 = vpop.f32.mrf.mxu3 }
 0x28c   :  { %v783_v19 = vadd.f32 %v1210_v41, %v782_v17 }
 0x28d   :  { %834 = vst.msk [vmem:[%s1693_s5 + $0x180] sm:$0xff] %vm785_vm1, %v738_v61 }
 0x28e   :  { %849 = vst.msk [vmem:[%s1693_s5 + $0x1f8] sm:$0xff] %vm785_vm1, %v783_v19 }
 0x292   :  { %v740_v62 = vpop.f32.mrf.mxu2 }
 0x293   :  { %v741_v63 = vadd.f32 %v1210_v41, %v740_v62 }
 0x295   :  { %835 = vst.msk [vmem:[%s1693_s5 + $0x188] sm:$0xff] %vm785_vm1, %v741_v63 }
 0x29a   :  { %v743_v0 = vpop.f32.mrf.mxu2 }
 0x29b   :  { %v744_v1 = vadd.f32 %v1210_v41, %v743_v0 }
 0x29d   :  { %836 = vst.msk [vmem:[%s1693_s5 + $0x190] sm:$0xff] %vm785_vm1, %v744_v1 }
 0x2a2   :  { %v746_v2 = vpop.f32.mrf.mxu2 }
 0x2a3   :  { %v747_v3 = vadd.f32 %v1210_v41, %v746_v2 }
 0x2a5   :  { %837 = vst.msk [vmem:[%s1693_s5 + $0x198] sm:$0xff] %vm785_vm1, %v747_v3 }
 0x2aa   :  { %v749_v4 = vpop.f32.mrf.mxu2 }
 0x2ab   :  { %v750_v5 = vadd.f32 %v1210_v41, %v749_v4 }
 0x2ad   :  { %838 = vst.msk [vmem:[%s1693_s5 + $0x1a0] sm:$0xff] %vm785_vm1, %v750_v5 }
 0x2b2   :  { %v752_v6 = vpop.f32.mrf.mxu2 }
 0x2b3   :  { %v753_v7 = vadd.f32 %v1210_v41, %v752_v6 }
 0x2b5   :  { %839 = vst.msk [vmem:[%s1693_s5 + $0x1a8] sm:$0xff] %vm785_vm1, %v753_v7 }
 0x2ba   :  { %v755_v8 = vpop.f32.mrf.mxu2 }
 0x2bb   :  { %v756_v9 = vadd.f32 %v1210_v41, %v755_v8 }
 0x2bd   :  { %840 = vst.msk [vmem:[%s1693_s5 + $0x1b0] sm:$0xff] %vm785_vm1, %v756_v9 }
 0x2c2   :  { %v758_v10 = vpop.f32.mrf.mxu2 }
 0x2c3   :  { %v759_v11 = vadd.f32 %v1210_v41, %v758_v10 }
 0x2c5   :  { %841 = vst.msk [vmem:[%s1693_s5 + $0x1b8] sm:$0xff] %vm785_vm1, %v759_v11 }
 0x2ca   :  { %v761_v12 = vpop.f32.mrf.mxu2 }
 0x2cb   :  { %v762_v14 = vadd.f32 %v1210_v41, %v761_v12 }
 0x2cd   :  { %842 = vst.msk [vmem:[%s1693_s5 + $0x1c0] sm:$0xff] %vm785_vm1, %v762_v14 }
 0x2d2   :  { %v764_v16 = vpop.f32.mrf.mxu2 }
 0x2d3   :  { %v765_v18 = vadd.f32 %v1210_v41, %v764_v16 }
 0x2d5   :  { %843 = vst.msk [vmem:[%s1693_s5 + $0x1c8] sm:$0xff] %vm785_vm1, %v765_v18 }
 0x2da   :  { %v767_v20 = vpop.f32.mrf.mxu2 }
 0x2db   :  { %v768_v21 = vadd.f32 %v1210_v41, %v767_v20 }
 0x2dd   :  { %844 = vst.msk [vmem:[%s1693_s5 + $0x1d0] sm:$0xff] %vm785_vm1, %v768_v21 }
 0x2e2   :  { %v770_v22 = vpop.f32.mrf.mxu2 }
 0x2e3   :  { %v771_v23 = vadd.f32 %v1210_v41, %v770_v22 }
 0x2e5   :  { %845 = vst.msk [vmem:[%s1693_s5 + $0x1d8] sm:$0xff] %vm785_vm1, %v771_v23 }
 0x2ea   :  { %v773_v24 = vpop.f32.mrf.mxu2 }
 0x2eb   :  { %v774_v25 = vadd.f32 %v1210_v41, %v773_v24 }
 0x2ed   :  { %846 = vst.msk [vmem:[%s1693_s5 + $0x1e0] sm:$0xff] %vm785_vm1, %v774_v25 }
 0x2f2   :  { %v776_v26 = vpop.f32.mrf.mxu2 }
 0x2f3   :  { %v777_v27 = vadd.f32 %v1210_v41, %v776_v26 }
 0x2f5   :  { %847 = vst.msk [vmem:[%s1693_s5 + $0x1e8] sm:$0xff] %vm785_vm1, %v777_v27 }

</bundles_post_ra>
